<compile_context>
chip_gen: v6e
topology: v6e:2x2x1
jax: 0.10.0
libtpu: 0.0.40
codegen_flags: <defaults>
</compile_context>

<pallas_src>
import functools

import jax
import jax.numpy as jnp
from jax.experimental import pallas as pl
from jax.experimental.pallas import tpu as pltpu

_EPS = 1e-6          # F.pairwise_distance default eps (added to the difference)
_SCALE_X = 12.0      # 8.0 * 1.5  (x / even lanes)
_SCALE_Y = 7.5       # 5.0 * 1.5  (y / odd lanes)
_PAD = 1e18          # finite sentinel: distance ~1.4e19 >> dmin, never counted
_LANE = 128


def _myloss2_kernel(scal_ref, x_ref, out_ref, *, tile, rows, blocks_per_core,
                    need_row_mask):
    """scal_ref: SMEM (3,) = [pos_x*12 - eps, pos_y*7.5 - eps, dmin].
    x_ref: (tile, 128) interleaved coordinates (x on even lanes, y on odd lanes).
    out_ref: (1, 16, 128) per-core partials; rows 0:8 = sum acc, rows 8:16 = count acc.
    """
    c = pl.program_id(0)          # TensorCore split ("parallel")
    i = pl.program_id(1)          # row-block index within this core ("arbitrary")

    @pl.when(i == 0)
    def _init():
        out_ref[...] = jnp.zeros_like(out_ref)

    off_x = scal_ref[0]           # pos_x * 12.0 - eps   (eps folded in)
    off_y = scal_ref[1]           # pos_y * 7.5  - eps
    dmin = scal_ref[2]

    # Per-lane scale / offset from lane parity (x on even lanes, y on odd lanes).
    lane = jax.lax.broadcasted_iota(jnp.int32, (tile, _LANE), 1)
    even = (lane & 1) == 0
    scale = jnp.where(even, _SCALE_X, _SCALE_Y)
    off = jnp.where(even, off_x, off_y)

    # diff = pred*scale - pos*scale + eps  (per coordinate, pure VPU)
    d = x_ref[...] * scale - off
    sq = d * d
    # Pair dx^2 (even lane) with the neighbouring dy^2 (odd lane to its right):
    # roll by +127 == roll by -1 along lanes (XLU slot, free here).
    pair = sq + pltpu.roll(sq, 127, 1)
    temp = jnp.sqrt(pair)         # valid distance on even lanes only

    mask = (temp < dmin) & even
    if need_row_mask:
        # Only compiled in when the last block is partial or a core gets a
        # duplicated (clamped) overflow block; invalid rows contribute nothing.
        row = jax.lax.broadcasted_iota(jnp.int32, (tile, _LANE), 0)
        base = (c * blocks_per_core + i) * tile
        mask = mask & ((base + row) < rows)

    contrib = jnp.where(mask, dmin - temp, 0.0)
    ones = jnp.where(mask, 1.0, 0.0)

    # (tile,128) -> (8,128): tile-aligned vreg adds, no cross-lane/XLU work.
    psum = contrib.reshape(tile // 8, 8, _LANE).sum(axis=0)
    pcnt = ones.reshape(tile // 8, 8, _LANE).sum(axis=0)
    out_ref[0, 0:8, :] += psum
    out_ref[0, 8:16, :] += pcnt


def _round_up(x, m):
    return -(-x // m) * m


@functools.partial(jax.jit, static_argnames=("tile",))
def myloss2(pred, pos, dmin, *, tile=2048):
    """pred: (N, 2) float32, pos: (2,) float32, dmin: scalar float32."""
    pred = jnp.asarray(pred, jnp.float32)
    pos = jnp.asarray(pos, jnp.float32).reshape(2)
    dmin = jnp.asarray(dmin, jnp.float32).reshape(())

    n = pred.shape[0]
    # Row-major flatten: [x0, y0, x1, y1, ...] -- a free bitcast, no HBM pass.
    flat = pred.reshape(-1)
    elems = 2 * n
    padded = max(8 * _LANE, _round_up(elems, _LANE))
    if padded != elems:
        # Minimal pad (only when 2N % 128 != 0 or N is tiny); sentinel points
        # land far outside dmin and contribute nothing.
        flat = jnp.pad(flat, (0, padded - elems), constant_values=_PAD)
    rows = padded // _LANE                      # >= 8
    x2d = flat.reshape(rows, _LANE)             # free reshape

    # Tile size: multiple of 8, never larger than the array, capped so that the
    # elementwise temporaries stay inside v5e's 16 MiB scoped-VMEM default.
    tile = min(int(tile), 4096, (rows // 8) * 8)
    tile = max(8, (tile // 8) * 8)

    total_blocks = -(-rows // tile)
    blocks_per_core = -(-total_blocks // 2)
    need_row_mask = (rows % tile != 0) or (total_blocks % 2 != 0)

    # Fold pos*scale and the pairwise_distance eps into 3 SMEM scalars.
    scalars = jnp.stack(
        [pos[0] * _SCALE_X - _EPS, pos[1] * _SCALE_Y - _EPS, dmin]
    ).astype(jnp.float32)

    kernel = functools.partial(
        _myloss2_kernel, tile=tile, rows=rows,
        blocks_per_core=blocks_per_core, need_row_mask=need_row_mask)

    def data_index_map(c, i):
        # Clamp so duplicated overflow blocks (odd block count) stay in bounds;
        # the in-kernel row mask zeroes their contribution.
        return (jnp.minimum(c * blocks_per_core + i, total_blocks - 1), 0)

    partials = pl.pallas_call(
        kernel,
        out_shape=jax.ShapeDtypeStruct((2, 16, _LANE), jnp.float32),
        grid=(2, blocks_per_core),
        in_specs=[
            pl.BlockSpec(memory_space=pltpu.MemorySpace.SMEM),   # scalars (3,)
            pl.BlockSpec((tile, _LANE), data_index_map),         # coord slab
        ],
        out_specs=pl.BlockSpec((1, 16, _LANE), lambda c, i: (c, 0, 0)),
        compiler_params=pltpu.CompilerParams(
            dimension_semantics=("parallel", "arbitrary")),
    )(scalars, x2d)

    # Tiny cross-core combine + final divide in plain jnp (2 x 8 KiB).
    total = jnp.sum(partials[:, 0:8, :])
    count = jnp.sum(partials[:, 8:16, :])       # f32-exact for any realistic N
    return total / (count + 0.01)


def _myloss2_ref(pred, pos, dmin):
    """Pure-JAX reference matching the PyTorch forward."""
    pred = jnp.asarray(pred, jnp.float32)
    pos_b = jnp.broadcast_to(jnp.reshape(pos, (1, 2)), pred.shape).astype(jnp.float32)
    scale = jnp.array([[_SCALE_X, _SCALE_Y]], jnp.float32)
    diff = pred * scale - pos_b * scale + _EPS
    temp = jnp.sqrt(jnp.sum(diff * diff, axis=1))
    n = jnp.maximum(dmin - temp, 0.0)
    return jnp.sum(n) / (jnp.sum(n != 0.0).astype(jnp.float32) + 0.01)


if __name__ == "__main__":
    key = jax.random.PRNGKey(0)
    k1, k2, k3, k4 = jax.random.split(key, 4)

    dmin = jnp.float32(3.0)
    pos = jax.random.uniform(k2, (2,), jnp.float32)

    # Case 1: N % 64 == 0 and N >= 512 -> zero-copy layout path; single block per
    # core (odd block count exercises the clamp + row-mask path).
    pred1 = jax.random.uniform(k1, (512, 2), jnp.float32)
    out1 = jax.block_until_ready(myloss2(pred1, pos, dmin))
    ref1 = _myloss2_ref(pred1, pos, dmin)
    assert jnp.allclose(out1, ref1, rtol=1e-4, atol=1e-5), (out1, ref1)

    # Case 2: several blocks per core (tile=8) -> exercises init / accumulate and
    # the two-core partial combine with no row masking.
    pred2 = jax.random.uniform(k3, (2048, 2), jnp.float32)
    out2 = jax.block_until_ready(myloss2(pred2, pos, dmin, tile=8))
    ref2 = _myloss2_ref(pred2, pos, dmin)
    assert jnp.allclose(out2, ref2, rtol=1e-4, atol=1e-5), (out2, ref2)

    # Case 3: ragged N (not a multiple of 64) -> minimal sentinel pad + row mask.
    pred3 = jax.random.uniform(k4, (1000, 2), jnp.float32)
    out3 = jax.block_until_ready(myloss2(pred3, pos, dmin))
    ref3 = _myloss2_ref(pred3, pos, dmin)
    assert jnp.allclose(out3, ref3, rtol=1e-4, atol=1e-5), (out3, ref3)

    print("KERNEL_OK")
</pallas_src>

<mosaic_0001>
module attributes {stable_mosaic.version = 11 : i64} {
  func.func @_myloss2_kernel(%arg0: i32, %arg1: i32, %arg2: memref<3xf32, #tpu.memory_space<smem>>, %arg3: memref<8x128xf32, #tpu.memory_space<vmem>>, %arg4: memref<1x16x128xf32, #tpu.memory_space<vmem>>) attributes {dimension_semantics = [#tpu.dimension_semantics<parallel>, #tpu.dimension_semantics<arbitrary>], iteration_bounds = array<i64: 2, 1>, scalar_prefetch = 0 : i64, scratch_operands = 0 : i64, tpu.core_type = #tpu.core_type<tc>, window_params = [{transform_indices = @transform_0, window_bounds = array<i64: 3>}, {transform_indices = @transform_1, window_bounds = array<i64: 8, 128>}, {transform_indices = @transform_2, window_bounds = array<i64: 1, 16, 128>}]} {
    %c0_i32 = arith.constant 0 : i32
    %0 = arith.cmpi eq, %arg1, %c0_i32 : i32
    %1 = arith.extui %0 : i1 to i32
    %c0_i32_0 = arith.constant 0 : i32
    %2 = arith.cmpi ne, %1, %c0_i32_0 : i32
    scf.if %2 {
      %cst_23 = arith.constant 0.000000e+00 : f32
      %59 = vector.broadcast %cst_23 : f32 to vector<1x16x128xf32>
      %c0_24 = arith.constant 0 : index
      %c0_25 = arith.constant 0 : index
      %c0_26 = arith.constant 0 : index
      %60 = vector.load %arg4[%c0_24, %c0_25, %c0_26] : memref<1x16x128xf32, #tpu.memory_space<vmem>>, vector<1x16x128xf32>
      tpu.vector_store %arg4[%c0_24, %c0_25, %c0_26], %59 {strides = array<i32>} : memref<1x16x128xf32, #tpu.memory_space<vmem>>, vector<1x16x128xf32>,
    } else {
    }
    %c0 = arith.constant 0 : index
    %3 = memref.load %arg2[%c0] : memref<3xf32, #tpu.memory_space<smem>>
    %c1 = arith.constant 1 : index
    %4 = memref.load %arg2[%c1] : memref<3xf32, #tpu.memory_space<smem>>
    %c2 = arith.constant 2 : index
    %5 = memref.load %arg2[%c2] : memref<3xf32, #tpu.memory_space<smem>>
    %6 = tpu.iota {dimensions = array<i32: 1>} : vector<8x128xi32>
    %c1_i32 = arith.constant 1 : i32
    %7 = vector.broadcast %c1_i32 : i32 to vector<8x128xi32>
    %8 = arith.andi %6, %7 : vector<8x128xi32>
    %c0_i32_1 = arith.constant 0 : i32
    %9 = vector.broadcast %c0_i32_1 : i32 to vector<8x128xi32>
    %10 = arith.cmpi eq, %8, %9 : vector<8x128xi32>
    %cst = arith.constant 1.200000e+01 : f32
    %cst_2 = arith.constant 7.500000e+00 : f32
    %11 = vector.broadcast %cst : f32 to vector<8x128xf32>
    %12 = vector.broadcast %cst_2 : f32 to vector<8x128xf32>
    %13 = arith.select %10, %11, %12 : vector<8x128xi1>, vector<8x128xf32>
    %14 = vector.broadcast %3 : f32 to vector<8x128xf32>
    %15 = vector.broadcast %4 : f32 to vector<8x128xf32>
    %16 = arith.select %10, %14, %15 : vector<8x128xi1>, vector<8x128xf32>
    %c0_3 = arith.constant 0 : index
    %c0_4 = arith.constant 0 : index
    %17 = vector.load %arg3[%c0_3, %c0_4] : memref<8x128xf32, #tpu.memory_space<vmem>>, vector<8x128xf32>
    %18 = arith.mulf %17, %13 : vector<8x128xf32>
    %19 = arith.subf %18, %16 : vector<8x128xf32>
    %20 = arith.mulf %19, %19 : vector<8x128xf32>
    %c127_i32 = arith.constant 127 : i32
    %21 = tpu.dynamic_rotate %20 by %c127_i32 dim 1 : vector<8x128xf32>, i32 -> vector<8x128xf32>
    %22 = arith.addf %20, %21 : vector<8x128xf32>
    %23 = math.sqrt %22 : vector<8x128xf32>
    %24 = vector.broadcast %5 : f32 to vector<8x128xf32>
    %25 = arith.cmpf olt, %23, %24 : vector<8x128xf32>
    %26 = arith.andi %25, %10 : vector<8x128xi1>
    %27 = tpu.iota {dimensions = array<i32: 0>} : vector<8x128xi32>
    %c1_i32_5 = arith.constant 1 : i32
    %28 = arith.muli %arg0, %c1_i32_5 : i32
    %29 = arith.addi %28, %arg1 : i32
    %c8_i32 = arith.constant 8 : i32
    %30 = arith.muli %29, %c8_i32 : i32
    %31 = vector.broadcast %30 : i32 to vector<8x128xi32>
    %32 = arith.addi %31, %27 : vector<8x128xi32>
    %c8_i32_6 = arith.constant 8 : i32
    %33 = vector.broadcast %c8_i32_6 : i32 to vector<8x128xi32>
    %34 = arith.cmpi slt, %32, %33 : vector<8x128xi32>
    %35 = arith.andi %26, %34 : vector<8x128xi1>
    %36 = vector.broadcast %5 : f32 to vector<8x128xf32>
    %37 = arith.subf %36, %23 : vector<8x128xf32>
    %cst_7 = arith.constant 0.000000e+00 : f32
    %38 = vector.broadcast %cst_7 : f32 to vector<8x128xf32>
    %39 = arith.select %35, %37, %38 : vector<8x128xi1>, vector<8x128xf32>
    %cst_8 = arith.constant 1.000000e+00 : f32
    %cst_9 = arith.constant 0.000000e+00 : f32
    %40 = vector.broadcast %cst_8 : f32 to vector<8x128xf32>
    %41 = vector.broadcast %cst_9 : f32 to vector<8x128xf32>
    %42 = arith.select %35, %40, %41 : vector<8x128xi1>, vector<8x128xf32>
    %43 = vector.shape_cast %39 : vector<8x128xf32> to vector<1x8x128xf32>
    %cst_10 = arith.constant dense<0.000000e+00> : vector<8x128xf32>
    %44 = vector.multi_reduction <add>, %43, %cst_10 [0] : vector<1x8x128xf32> to vector<8x128xf32>
    %45 = vector.shape_cast %42 : vector<8x128xf32> to vector<1x8x128xf32>
    %cst_11 = arith.constant dense<0.000000e+00> : vector<8x128xf32>
    %46 = vector.multi_reduction <add>, %45, %cst_11 [0] : vector<1x8x128xf32> to vector<8x128xf32>
    %c0_12 = arith.constant 0 : index
    %c0_13 = arith.constant 0 : index
    %c0_14 = arith.constant 0 : index
    %47 = vector.load %arg4[%c0_12, %c0_13, %c0_14] : memref<1x16x128xf32, #tpu.memory_space<vmem>>, vector<1x8x128xf32>
    %48 = vector.shape_cast %47 : vector<1x8x128xf32> to vector<8x128xf32>
    %49 = arith.addf %48, %44 : vector<8x128xf32>
    %c0_15 = arith.constant 0 : index
    %c0_16 = arith.constant 0 : index
    %c0_17 = arith.constant 0 : index
    %50 = vector.load %arg4[%c0_15, %c0_16, %c0_17] : memref<1x16x128xf32, #tpu.memory_space<vmem>>, vector<1x8x128xf32>
    %51 = vector.shape_cast %50 : vector<1x8x128xf32> to vector<8x128xf32>
    %52 = vector.shape_cast %49 : vector<8x128xf32> to vector<1x8x128xf32>
    tpu.vector_store %arg4[%c0_15, %c0_16, %c0_17], %52 {strides = array<i32>} : memref<1x16x128xf32, #tpu.memory_space<vmem>>, vector<1x8x128xf32>,
    %c0_18 = arith.constant 0 : index
    %c8 = arith.constant 8 : index
    %c0_19 = arith.constant 0 : index
    %53 = vector.load %arg4[%c0_18, %c8, %c0_19] : memref<1x16x128xf32, #tpu.memory_space<vmem>>, vector<1x8x128xf32>
    %54 = vector.shape_cast %53 : vector<1x8x128xf32> to vector<8x128xf32>
    %55 = arith.addf %54, %46 : vector<8x128xf32>
    %c0_20 = arith.constant 0 : index
    %c8_21 = arith.constant 8 : index
    %c0_22 = arith.constant 0 : index
    %56 = vector.load %arg4[%c0_20, %c8_21, %c0_22] : memref<1x16x128xf32, #tpu.memory_space<vmem>>, vector<1x8x128xf32>
    %57 = vector.shape_cast %56 : vector<1x8x128xf32> to vector<8x128xf32>
    %58 = vector.shape_cast %55 : vector<8x128xf32> to vector<1x8x128xf32>
    tpu.vector_store %arg4[%c0_20, %c8_21, %c0_22], %58 {strides = array<i32>} : memref<1x16x128xf32, #tpu.memory_space<vmem>>, vector<1x8x128xf32>,
    return
  }
  func.func @transform_0(%arg0: i32, %arg1: i32) -> i32 {
    %c0_i32 = arith.constant 0 : i32
    %c0_i32_0 = arith.constant 0 : i32
    return %c0_i32 : i32
  }
  func.func @transform_1(%arg0: i32, %arg1: i32) -> (i32, i32) {
    %c1_i32 = arith.constant 1 : i32
    %0 = arith.muli %arg0, %c1_i32 : i32
    %1 = arith.addi %0, %arg1 : i32
    %c0_i32 = arith.constant 0 : i32
    %2 = arith.minsi %1, %c0_i32 : i32
    %c0_i32_0 = arith.constant 0 : i32
    %c0_i32_1 = arith.constant 0 : i32
    return %2, %c0_i32_0 : i32, i32
  }
  func.func @transform_2(%arg0: i32, %arg1: i32) -> (i32, i32, i32) {
    %c0_i32 = arith.constant 0 : i32
    %c0_i32_0 = arith.constant 0 : i32
    %c0_i32_1 = arith.constant 0 : i32
    return %arg0, %c0_i32, %c0_i32_0 : i32, i32, i32
  }
}

</mosaic_0001>

<bundles_post_ra>
// kernel: myloss2.1
= control target key start
LH: loop header
LB: loop body
LE: loop exit
PB: predicated region body
PF: predicated region fallthrough
CT: control target
= control target key end

     0   :  { %7 = vsyncpa [#allocation3], 0  ;;  %s438_s9 = smov 0   ;;  %s440_s10 = smov 0   ;;  %s510_s0 = inlined_call_operand.vmem [shape: f32[3], index: 0, kind: input, shape index: {}]   ;;  %s511_s1 = inlined_call_operand.vmem [shape: f32[8,128], index: 1, kind: input, shape index: {}]   ;;  %s512_s2 = inlined_call_operand.vmem [shape: f32[2,16,128], index: 2, kind: output, shape index: {}]  }
   0x1   :  { %s442_s11 = smov 0  }
   0x2 LB: > { %s317_s12 = sadd.s32 4294967295, %s417_s11   ;;  %s25_s13 = sadd.s32 1, %s413_s10  ;;  %s417_s11 = sphi %s442_s11, %s13_s11   ;;  %s413_s10 = sphi %s440_s10, %s518_s10   ;;  %s409_s9 = sphi %s438_s9, %s517_s9  }
   0x3   : > { %p27_p0 = scmp.ge.s32.totalorder %s25_s13, 2  ;;  %p319_p1 = scmp.ge.s32.totalorder %s417_s11, 1 }
   0x4   : > { %p109_p2 = scmp.lt.s32.totalorder %s417_s11, 3  ;;  %p463_p4 = scmp.eq.s32.totalorder %s317_s12, 0 }
   0x5   : > { %s520_s13 = smov (%p27_p0, %s25_s13), 0  ;;  %s122_s18 = sshll.u32 %s510_s0, 4  ;;  %s123_s18 = int_to_ptr.vmem [resolvable:$true] %s122_s18 }
   0x6   : > { %p459_p3 = pnand %p319_p1, %p109_p2  ;;  %s376_s19 = scalar_lea.vmem %s123_s18, 16 }
   0x7   : > { %p377_p7 = scmp.ne.s32.totalorder %s123_s18, %s376_s19  ;;  %p384_p11 = scmp.lt.s32.totalorder %s123_s18, %s123_s18 }
   0x8   : > { %p340_p5 = pneg %p459_p3  ;;  %p385_p12 = scmp.lt.s32.totalorder %s376_s19, %s376_s19 }
   0xa   : > { %p341_p6 = pnand %p463_p4, %p340_p5  ;;  %p386_p13 = por %p385_p12, %p384_p11 }
   0xc   : > { %p378_p8 = pneg %p341_p6 }
   0xe   : > { %p379_p9 = pnand %p378_p8, %p377_p7 }
  0x10   : > { %p380_p10 = pneg %p379_p9 }
  0x12   : > { %p387_p0 = pnand %p386_p13, %p380_p10 }
  0x14   : > { %390 = shalt.err (!%p387_p0)
}
  0x15   : > { %s419_s20 = smov [#allocation2]   ;;  %148 = sbr.rel (%p459_p3) target bundleno = 183 (0xb7), region = 28 }
  0x16   : > { %343 = dma.vmem_to_smem (!%p341_p6), %s123_s18, 16, %s419_s20, [#allocation3]  }
  0x1a   : > { %404 = dma.done.wait (%p463_p4), [#allocation3], 16  }
  0x1b   : > { %406 = vsyncadd (%p463_p4), [#allocation3], 4294967280 }
  0x1c   : > { %154 = sfence }
  0x1d   : > { %p174_p1 = scmp.lt.s32.totalorder %s409_s9, 0  ;;  %s194_s21 = sld [smem:[#allocation2]]  ;;  %v197_v0 = vlaneseq  ;;  %v420_v5 = vmov 7.5   ;;  %v422_v26 = vmov 0.0  }
  0x1e   : > { %s330_s22 = sld [smem:[#allocation2 + $0x1]]  ;;  %s421_s28 = smov 127  }
  0x1f   : > { %s175_s23 = scalar_select %p174_p1, %s409_s9, 0  ;;  %v198_v1 = vand.u32 127, %v197_v0  ;;  %v223_v15 = vshrl.u32 %v197_v0, 7 }
  0x20   : > { %s332_s29 = sshll.u32 %s409_s9, 3  ;;  %s331_s30 = sld [smem:[#allocation2 + $0x2]] }
  0x21   : > { %s522_s23 = smov (!%p174_p1, %s175_s23), 0  ;;  %v199_v2 = vand.u32 1, %v198_v1  ;;  %v226_v16 = vstv %s332_s29  ;;  %p183_p2 = scmp.lt.s32.totalorder %s409_s9, 1 }
  0x22   : > { %s327_s24 = sshll.u32 %s522_s23, 3  ;;  %v227_v18 = vadd.s32 %v226_v16, %v223_v15 }
  0x23   : > { %vm482_vm0 = vcmp.eq.s32.totalorder %v199_v2, 0  ;;  %v202_v4 = vstv %s194_s21  ;;  %s179_s27 = scalar_lea.vmem %s511_s1, %s327_s24  ;;  %s524_s9 = smov (!%p183_p2, %s409_s9), 1 }
  0x24   : > { %v201_v6 = vsel %vm482_vm0, 12.0, %v420_v5  ;;  %v203_v7 = vstv %s330_s22  ;;  %v205_v9 = vld [vmem:[%s179_s27] sm:$0xff]  ;;  %vm228_vm3 = vcmp.lt.s32.totalorder %v227_v18, 8  ;;  %s335_s3 = sshll.u32 %s524_s9, 4 }
  0x25   : > { %v204_v8 = vsel %vm482_vm0, %v202_v4, %v203_v7  ;;  %v206_v10 = vmul.f32 %v205_v9, %v201_v6  ;;  %s187_s6 = scalar_lea.vmem %s512_s2, %s335_s3 }
  0x26   : > { %v219_v21 = vstv %s331_s30 }
  0x27   : > { %v207_v11 = vsub.f32 %v206_v10, %v204_v8 }
  0x29   : > { %v208_v12 = vmul.f32 %v207_v11, %v207_v11 }
  0x2b   : > { %209 = vrot.lane.b32.xlu0 %v208_v12, %s421_s28 }
  0x9d   : > { %v210_v13 = vpop.permute.xlu0 %209 }
  0x9e   : > { %v211_v14 = vadd.f32 %v210_v13, %v208_v12 }
  0xa0   : > { %374 = vrsqrt.f32 %v211_v14  ;;  %vm214_vm1 = vcmp.eq.f32.partialorder %v211_v14, inf  ;;  %v217_v20 = vand.u32 2147483648, %v211_v14  ;;  %vm216_vm2 = vcmp.eq.f32.partialorder %v211_v14, 0.0 }
  0xad   : > { %v375_v17 = vpop.eup %374 }
  0xae   : > { %v213_v19 = vmul.f32 %v375_v17, %v211_v14 }
  0xb0   : > { %v215_v22 = vsel %vm214_vm1, %v211_v14, %v213_v19 }
  0xb1   : > { %v218_v23 = vsel %vm216_vm2, %v217_v20, %v215_v22 }
  0xb2   : > { %vm220_vm4 = vcmp.lt.f32.partialorder %v218_v23, %v219_v21  ;;  %v230_v24 = vsub.f32 %v219_v21, %v218_v23 }
  0xb3   : > { %vm221_vm5 = vmand %vm220_vm4, %vm482_vm0 }
  0xb4   : > { %vm229_vm6 = vmand %vm221_vm5, %vm228_vm3 }
  0xb5   : > { %v231_v25 = vsel %vm229_vm6, %v230_v24, 0.0  ;;  %v232_v27 = vsel %vm229_vm6, 1.0, %v422_v26 }
  0xb6   : > { %237 = vst [vmem:[%s187_s6] sm:$0xff] %v231_v25  ;;  %240 = vst [vmem:[%s187_s6 + $0x8] sm:$0xff] %v232_v27 }
  0xb7 PF: > { %s13_s11 = sadd.s32 1, %s417_s11   ;;  %s517_s9 = smov %s413_s10 }
  0xb8   : > { %p10_p3 = scmp.ge.s32.totalorder %s13_s11, 4   ;;  %s518_s10 = smov %s520_s13 }
  0xba   :  { %12 = sbr.rel (!%p10_p3) target bundleno = 2 (0x2), region = 67 }
  0xbf   :  { %262 = vsyncpa [#allocation3], 1 }
  0xc0   :  { %264 = vsyncpa [#allocation3 + $0x1], 1 }

</bundles_post_ra>
